<compile_context>
chip_gen: v6e
topology: v6e:2x2x1
jax: 0.10.0
libtpu: 0.0.40
codegen_flags: <defaults>
</compile_context>

<pallas_src>
import functools
import math

import jax
import jax.numpy as jnp
from jax.experimental import pallas as pl
from jax.experimental.pallas import tpu as pltpu

_VMEM_LIMIT = 64 * 1024 * 1024     # explicit scoped-VMEM budget; fits v5e/v6e/v7x


# ----------------------------- small helpers --------------------------------

def _round_up(x, m):
    return ((x + m - 1) // m) * m


def _cp(c):
    return _round_up(c, 128)


def _pick_tile(n, candidates):
    for c in candidates:
        if c <= n and n % c == 0:
            return c
    return n                      # full-dim block (always legal)


def _pick_ctile(cp_, phase_elems):
    for c in (512, 384, 256, 128):
        if cp_ % c == 0 and phase_elems * c * 2 <= (4 << 20):
            return c
    return 128


def _pad_mat(w, rows, cols):
    return jnp.pad(w, ((0, rows - w.shape[0]), (0, cols - w.shape[1])))


def _pad_cols(w, cols):
    return jnp.pad(w, ((0, 0), (0, cols - w.shape[1])))


def _pad_rows(w, rows):
    return jnp.pad(w, ((0, rows - w.shape[0]), (0, 0)))


def _pad_vec(v, n):
    return jnp.pad(v, (0, n - v.shape[0]))


# ----------------------- matmul (1x1 conv) + fused epilogue ------------------

def _mm_kernel(*refs, act, has_se, has_res):
    i = 0
    a_ref = refs[i]; i += 1
    w_ref = refs[i]; i += 1
    b_ref = refs[i]; i += 1
    s_ref = None
    r_ref = None
    if has_se:
        s_ref = refs[i]; i += 1
    if has_res:
        r_ref = refs[i]; i += 1
    o_ref = refs[i]

    a = a_ref[0]                                            # (tp, K) bf16
    if has_se:                                              # per-(batch,channel) SE scale
        a = (a.astype(jnp.float32) * s_ref[0]).astype(jnp.bfloat16)
    acc = jnp.dot(a, w_ref[...], preferred_element_type=jnp.float32)
    acc = acc + b_ref[0]                                    # folded BN shift / bias
    if act == "silu":
        acc = acc * jax.nn.sigmoid(acc)
    elif act == "sigmoid":
        acc = jax.nn.sigmoid(acc)
    if has_res:                                             # fused residual add
        acc = acc + r_ref[0].astype(jnp.float32)
    o_ref[0] = acc.astype(o_ref.dtype)


def matmul_bias_act(a, w, bias, act=None, se=None, res=None, out_dtype=jnp.bfloat16):
    """a: (N,P,K) -> (N,P,Cout) = act(a [*se] @ w + bias) [+ res]."""
    a = a.astype(jnp.bfloat16)
    N, P, K = a.shape
    Cout = w.shape[1]
    tp = _pick_tile(P, (512, 256, 128, 64, 32, 16, 8))
    tn = _pick_tile(Cout, (512, 384, 256, 128))

    in_specs = [
        pl.BlockSpec((1, tp, K), lambda n, i, j: (n, i, 0)),
        pl.BlockSpec((K, tn), lambda n, i, j: (0, j)),
        pl.BlockSpec((1, 1, tn), lambda n, i, j: (0, 0, j)),
    ]
    args = [a, w, bias]
    if se is not None:
        in_specs.append(pl.BlockSpec((1, 1, K), lambda n, i, j: (n, 0, 0)))
        args.append(se)
    if res is not None:
        in_specs.append(pl.BlockSpec((1, tp, tn), lambda n, i, j: (n, i, j)))
        args.append(res.astype(jnp.bfloat16))

    return pl.pallas_call(
        functools.partial(_mm_kernel, act=act, has_se=se is not None,
                          has_res=res is not None),
        out_shape=jax.ShapeDtypeStruct((N, P, Cout), out_dtype),
        grid=(N, P // tp, Cout // tn),
        in_specs=in_specs,
        out_specs=pl.BlockSpec((1, tp, tn), lambda n, i, j: (n, i, j)),
        compiler_params=pltpu.CompilerParams(
            dimension_semantics=("parallel", "parallel", "parallel"),
            vmem_limit_bytes=_VMEM_LIMIT),
    )(*args)


# --------------------- depthwise conv (in-kernel taps) -----------------------

def _dw_kernel(x_ref, w_ref, sc_ref, sh_ref, o_ref, *, k, s, Ho, Wo):
    tc = o_ref.shape[-1]
    acc = jnp.zeros((Ho, Wo, tc), jnp.float32)
    for kh in range(k):                                   # static unroll over taps
        for kw in range(k):
            p = (kh % s) * s + (kw % s)                   # stride phase
            a, b = kh // s, kw // s
            tap = x_ref[p, a:a + Ho, b:b + Wo, :].astype(jnp.float32)
            w_tap = w_ref[kh * k + kw].reshape(1, 1, tc)
            acc = acc + tap * w_tap
    acc = acc * sc_ref[...].reshape(1, 1, tc) + sh_ref[...].reshape(1, 1, tc)
    acc = acc * jax.nn.sigmoid(acc)                       # SiLU
    o_ref[0] = acc.astype(o_ref.dtype)


def dwconv_bn_act(x, w_kk_c, scale, shift, k, stride):
    """x: (N,H,W,Cp) bf16; w: (k*k,Cp); scale/shift: (1,Cp) -> (N,Ho,Wo,Cp) bf16."""
    N, H, W, Cp = x.shape
    pad = k // 2
    s = stride
    Ho = (H + 2 * pad - k) // s + 1
    Wo = (W + 2 * pad - k) // s + 1
    Hph = Ho + (k - 1) // s
    Wph = Wo + (k - 1) // s
    hp_need, wp_need = s * Hph, s * Wph
    # TODO(synk): symmetric k//2 padding (torchvision-style); tf-port B0 uses
    # asymmetric SAME padding on stride-2 layers.
    xp = jnp.pad(x, ((0, 0), (pad, hp_need - H - pad), (pad, wp_need - W - pad), (0, 0)))
    if s == 1:
        phases = xp                                       # (N*1, Hph, Wph, Cp)
    else:                                                 # stride-phase decomposition
        phases = xp.reshape(N, Hph, s, Wph, s, Cp).transpose(0, 2, 4, 1, 3, 5)
        phases = phases.reshape(N * s * s, Hph, Wph, Cp)

    tc = _pick_ctile(Cp, s * s * Hph * Wph)
    return pl.pallas_call(
        functools.partial(_dw_kernel, k=k, s=s, Ho=Ho, Wo=Wo),
        out_shape=jax.ShapeDtypeStruct((N, Ho, Wo, Cp), jnp.bfloat16),
        grid=(N, Cp // tc),
        in_specs=[
            pl.BlockSpec((s * s, Hph, Wph, tc), lambda n, c: (n, 0, 0, c)),
            pl.BlockSpec((k * k, tc), lambda n, c: (0, c)),
            pl.BlockSpec((1, tc), lambda n, c: (0, c)),
            pl.BlockSpec((1, tc), lambda n, c: (0, c)),
        ],
        out_specs=pl.BlockSpec((1, Ho, Wo, tc), lambda n, c: (n, 0, 0, c)),
        compiler_params=pltpu.CompilerParams(
            dimension_semantics=("parallel", "parallel"),
            vmem_limit_bytes=_VMEM_LIMIT),
    )(phases, w_kk_c, scale, shift)


# --------------------------- global average pool -----------------------------

def _gap_kernel(x_ref, o_ref, acc_ref, *, inv_p):
    @pl.when(pl.program_id(1) == 0)
    def _():
        acc_ref[...] = jnp.zeros_like(acc_ref)
    acc_ref[...] += jnp.sum(x_ref[0].astype(jnp.float32), axis=0, keepdims=True)

    @pl.when(pl.program_id(1) == pl.num_programs(1) - 1)
    def _():
        o_ref[0] = acc_ref[...] * inv_p


def global_avg_pool(x):
    """x: (N,P,Cp) bf16 -> (N,1,Cp) f32."""
    N, P, Cp = x.shape
    tp = _pick_tile(P, (512, 256, 128, 64, 32, 16, 8))
    return pl.pallas_call(
        functools.partial(_gap_kernel, inv_p=1.0 / P),
        out_shape=jax.ShapeDtypeStruct((N, 1, Cp), jnp.float32),
        grid=(N, P // tp),
        in_specs=[pl.BlockSpec((1, tp, Cp), lambda n, i: (n, i, 0))],
        out_specs=pl.BlockSpec((1, 1, Cp), lambda n, i: (n, 0, 0)),
        scratch_shapes=[pltpu.VMEM((1, Cp), jnp.float32)],
        compiler_params=pltpu.CompilerParams(
            dimension_semantics=("parallel", "arbitrary"),
            vmem_limit_bytes=_VMEM_LIMIT),
    )(x)


# ------------------------------ JAX glue ops ---------------------------------

def _im2col(x, k, stride, pad):
    """Only used for the tiny 3-channel stem conv."""
    N, H, W, C = x.shape
    xp = jnp.pad(x, ((0, 0), (pad, pad), (pad, pad), (0, 0)))
    Ho = (H + 2 * pad - k) // stride + 1
    Wo = (W + 2 * pad - k) // stride + 1
    cols = []
    for kh in range(k):
        for kw in range(k):
            cols.append(xp[:, kh: kh + (Ho - 1) * stride + 1: stride,
                              kw: kw + (Wo - 1) * stride + 1: stride, :])
    p = jnp.stack(cols, axis=-2)                         # (N,Ho,Wo,KK,C)
    return p.reshape(N, Ho * Wo, k * k * C), Ho, Wo


# ----------------------------- parameter setup -------------------------------

class ParamGen:
    def __init__(self, seed=0):
        self.key = jax.random.PRNGKey(seed)
        self.count = 0

    def _next(self):
        self.count += 1
        return jax.random.fold_in(self.key, self.count)

    def normal(self, shape, std):
        return jax.random.normal(self._next(), shape, jnp.float32) * std

    def uniform(self, shape, lo, hi):
        return jax.random.uniform(self._next(), shape, jnp.float32, lo, hi)


def make_bn(pg, c, eps=1e-3):
    gamma = pg.uniform((c,), 0.8, 1.2)
    beta = pg.normal((c,), 0.01)
    mean = pg.normal((c,), 0.01)
    var = pg.uniform((c,), 0.9, 1.1)
    scale = gamma / jnp.sqrt(var + eps)
    shift = beta - mean * scale
    return scale, shift


# EfficientNet-B0 stage config: (expand_ratio, kernel, stride, out_ch, repeats)
B0_STAGES = [
    (1, 3, 1, 16, 1),
    (6, 3, 2, 24, 2),
    (6, 5, 2, 40, 2),
    (6, 3, 2, 80, 3),
    (6, 5, 1, 112, 3),
    (6, 5, 2, 192, 4),
    (6, 3, 1, 320, 1),
]


def init_params(seed=0):
    pg = ParamGen(seed)
    params = {}

    # stem: 3x3 stride-2 conv 3->32 + BN + SiLU (folded, im2col weight layout)
    w = pg.normal((32, 3, 3, 3), math.sqrt(2.0 / (3 * 9)))          # OIHW
    sc, sh = make_bn(pg, 32)
    wmat = jnp.transpose(w, (2, 3, 1, 0)).reshape(27, 32) * sc[None, :]
    params["stem"] = {"w": _pad_cols(wmat, _cp(32)).astype(jnp.bfloat16),
                      "b": _pad_vec(sh, _cp(32)).reshape(1, 1, -1)}

    blocks = []
    cin = 32
    for (exp, k, stride, cout, reps) in B0_STAGES:
        for r in range(reps):
            s = stride if r == 0 else 1
            cmid = cin * exp
            se_c = max(1, cin // 4)
            cin_p, cmid_p, cout_p = _cp(cin), _cp(cmid), _cp(cout)
            blk = {"k": k, "stride": s, "residual": (s == 1 and cin == cout)}

            if exp != 1:                                   # 1x1 expand + BN + SiLU
                we = pg.normal((cmid, cin), math.sqrt(2.0 / cin))
                bsc, bsh = make_bn(pg, cmid)
                wm = we.T * bsc[None, :]
                blk["expand"] = {"w": _pad_mat(wm, cin_p, cmid_p).astype(jnp.bfloat16),
                                 "b": _pad_vec(bsh, cmid_p).reshape(1, 1, -1)}
            else:
                blk["expand"] = None

            wdw = pg.normal((cmid, k * k), math.sqrt(2.0 / (k * k)))
            bsc, bsh = make_bn(pg, cmid)
            blk["dw"] = {"w": _pad_cols(wdw.T, cmid_p),
                         "scale": _pad_vec(bsc, cmid_p).reshape(1, -1),
                         "shift": _pad_vec(bsh, cmid_p).reshape(1, -1)}

            w1 = pg.normal((se_c, cmid), math.sqrt(2.0 / cmid))
            w2 = pg.normal((cmid, se_c), math.sqrt(2.0 / se_c))
            blk["se"] = {"w1": _pad_rows(w1.T, cmid_p),            # (cmid_p, se_c)
                         "b1": jnp.zeros((se_c,), jnp.float32),
                         "w2": _pad_cols(w2.T, cmid_p),            # (se_c, cmid_p)
                         "b2": jnp.zeros((cmid_p,), jnp.float32)}

            wp = pg.normal((cout, cmid), math.sqrt(2.0 / cmid))
            bsc, bsh = make_bn(pg, cout)
            wm = wp.T * bsc[None, :]
            blk["proj"] = {"w": _pad_mat(wm, cmid_p, cout_p).astype(jnp.bfloat16),
                           "b": _pad_vec(bsh, cout_p).reshape(1, 1, -1)}
            blocks.append(blk)
            cin = cout
    params["blocks"] = blocks

    wh = pg.normal((1280, 320), math.sqrt(2.0 / 320))
    sc, sh = make_bn(pg, 1280)
    params["head"] = {"w": _pad_mat(wh.T * sc[None, :], _cp(320), 1280).astype(jnp.bfloat16),
                      "b": sh.reshape(1, 1, -1)}

    # classifier fc: xavier_normal_ weight, zero bias (matches ISIC.initialize_weights)
    wf = pg.normal((8, 1280), math.sqrt(2.0 / (1280 + 8)))
    params["fc"] = {"w": _pad_cols(wf.T, _cp(8)).astype(jnp.bfloat16),
                    "b": jnp.zeros((1, 1, _cp(8)), jnp.float32)}
    return params


# --------------------------------- forward -----------------------------------

def isic_forward(params, x_nchw):
    # PyTorch reference input is NCHW -> convert to NHWC kernel layout.
    x = jnp.transpose(x_nchw, (0, 2, 3, 1)).astype(jnp.float32)
    N = x.shape[0]

    # stem
    patches, Ho, Wo = _im2col(x, 3, 2, 1)
    st = params["stem"]
    x = matmul_bias_act(patches, st["w"], st["b"], act="silu")
    x = x.reshape(N, Ho, Wo, st["w"].shape[1])

    for blk in params["blocks"]:
        inp = x
        h = x
        if blk["expand"] is not None:                      # 1x1 expand + BN + SiLU
            n_, hh, ww, c = h.shape
            e = blk["expand"]
            h = matmul_bias_act(h.reshape(n_, hh * ww, c), e["w"], e["b"], act="silu")
            h = h.reshape(n_, hh, ww, e["w"].shape[1])

        d = blk["dw"]                                      # depthwise + BN + SiLU
        h = dwconv_bn_act(h, d["w"], d["scale"], d["shift"], blk["k"], blk["stride"])

        # Squeeze-and-Excitation: pooled squeeze in Pallas, tiny FCs in XLA.
        n_, ho, wo, cm = h.shape
        g = global_avg_pool(h.reshape(n_, ho * wo, cm))[:, 0, :]       # (N, cm) f32
        se = blk["se"]
        s1 = jax.nn.silu(g @ se["w1"] + se["b1"])
        sv = jax.nn.sigmoid(s1 @ se["w2"] + se["b2"])[:, None, :]      # (N, 1, cm)

        # 1x1 projection + BN, fused with SE channel-scale and residual add.
        pr = blk["proj"]
        res = inp.reshape(n_, ho * wo, -1) if blk["residual"] else None
        h = matmul_bias_act(h.reshape(n_, ho * wo, cm), pr["w"], pr["b"],
                            act=None, se=sv, res=res)
        x = h.reshape(n_, ho, wo, pr["w"].shape[1])

    # head 1x1 (320 -> 1280) + BN + SiLU, global pool, classifier
    n_, hh, ww, c = x.shape
    hd = params["head"]
    x = matmul_bias_act(x.reshape(n_, hh * ww, c), hd["w"], hd["b"], act="silu")
    g = global_avg_pool(x)                                 # (N, 1, 1280) f32
    # TODO(synk): Dropout(p=0.2) omitted — inference-mode forward (identity).
    fc = params["fc"]
    logits = matmul_bias_act(g, fc["w"], fc["b"], act=None, out_dtype=jnp.float32)
    return logits[:, 0, :8]                                # (N, 8)


# --------------------------------- driver -------------------------------------

if __name__ == "__main__":
    params = init_params(seed=0)
    x = jax.random.normal(jax.random.PRNGKey(0), (2, 3, 32, 32), jnp.float32)  # NCHW
    logits = isic_forward(params, x)
    logits = jax.block_until_ready(logits)
    assert logits.shape == (2, 8), logits.shape
    assert bool(jnp.all(jnp.isfinite(logits)))
    print("KERNEL_OK")
</pallas_src>

<mosaic_0001>
module attributes {stable_mosaic.version = 11 : i64} {
  func.func @_mm_kernel(%arg0: i32, %arg1: i32, %arg2: i32, %arg3: memref<1x256x27xbf16, #tpu.memory_space<vmem>>, %arg4: memref<27x128xbf16, #tpu.memory_space<vmem>>, %arg5: memref<1x1x128xf32, #tpu.memory_space<vmem>>, %arg6: memref<1x256x128xbf16, #tpu.memory_space<vmem>>) attributes {dimension_semantics = [#tpu.dimension_semantics<parallel>, #tpu.dimension_semantics<parallel>, #tpu.dimension_semantics<parallel>], iteration_bounds = array<i64: 2, 1, 1>, scalar_prefetch = 0 : i64, scratch_operands = 0 : i64, tpu.core_type = #tpu.core_type<tc>, window_params = [{transform_indices = @transform_0, window_bounds = array<i64: 1, 256, 27>}, {transform_indices = @transform_1, window_bounds = array<i64: 27, 128>}, {transform_indices = @transform_2, window_bounds = array<i64: 1, 1, 128>}, {transform_indices = @transform_3, window_bounds = array<i64: 1, 256, 128>}]} {
    %c0 = arith.constant 0 : index
    %c0_0 = arith.constant 0 : index
    %c0_1 = arith.constant 0 : index
    %0 = vector.load %arg3[%c0, %c0_0, %c0_1] : memref<1x256x27xbf16, #tpu.memory_space<vmem>>, vector<1x256x27xbf16>
    %1 = vector.shape_cast %0 : vector<1x256x27xbf16> to vector<256x27xbf16>
    %c0_2 = arith.constant 0 : index
    %c0_3 = arith.constant 0 : index
    %2 = vector.load %arg4[%c0_2, %c0_3] : memref<27x128xbf16, #tpu.memory_space<vmem>>, vector<27x128xbf16>
    %cst = arith.constant dense<0.000000e+00> : vector<256x128xf32>
    %3 = tpu.matmul %1, %2, %cst {dimension_numbers = #tpu.dot_dimension_numbers<[1], [0], [0], [1], [0, 0, 1, 1], [], []>} : vector<256x27xbf16>, vector<27x128xbf16>, vector<256x128xf32> -> vector<256x128xf32>
    %c0_4 = arith.constant 0 : index
    %c0_5 = arith.constant 0 : index
    %c0_6 = arith.constant 0 : index
    %4 = vector.load %arg5[%c0_4, %c0_5, %c0_6] : memref<1x1x128xf32, #tpu.memory_space<vmem>>, vector<1x1x128xf32>
    %5 = vector.shape_cast %4 : vector<1x1x128xf32> to vector<1x128xf32>
    %6 = vector.broadcast %5 : vector<1x128xf32> to vector<256x128xf32>
    %7 = arith.addf %3, %6 : vector<256x128xf32>
    %8 = arith.negf %7 : vector<256x128xf32>
    %9 = math.exp %8 : vector<256x128xf32>
    %cst_7 = arith.constant 1.000000e+00 : f32
    %10 = vector.broadcast %cst_7 : f32 to vector<256x128xf32>
    %11 = arith.addf %10, %9 : vector<256x128xf32>
    %12 = arith.divf %10, %11 : vector<256x128xf32>
    %13 = arith.mulf %7, %12 : vector<256x128xf32>
    %14 = arith.truncf %13 : vector<256x128xf32> to vector<256x128xbf16>
    %c0_8 = arith.constant 0 : index
    %c0_9 = arith.constant 0 : index
    %c0_10 = arith.constant 0 : index
    %15 = vector.load %arg6[%c0_8, %c0_9, %c0_10] : memref<1x256x128xbf16, #tpu.memory_space<vmem>>, vector<1x256x128xbf16>
    %16 = vector.shape_cast %15 : vector<1x256x128xbf16> to vector<256x128xbf16>
    %17 = vector.shape_cast %14 : vector<256x128xbf16> to vector<1x256x128xbf16>
    tpu.vector_store %arg6[%c0_8, %c0_9, %c0_10], %17 {strides = array<i32>} : memref<1x256x128xbf16, #tpu.memory_space<vmem>>, vector<1x256x128xbf16>,
    return
  }
  func.func @transform_0(%arg0: i32, %arg1: i32, %arg2: i32) -> (i32, i32, i32) {
    %c0_i32 = arith.constant 0 : i32
    %c0_i32_0 = arith.constant 0 : i32
    return %arg0, %arg1, %c0_i32 : i32, i32, i32
  }
  func.func @transform_1(%arg0: i32, %arg1: i32, %arg2: i32) -> (i32, i32) {
    %c0_i32 = arith.constant 0 : i32
    %c0_i32_0 = arith.constant 0 : i32
    return %c0_i32, %arg2 : i32, i32
  }
  func.func @transform_2(%arg0: i32, %arg1: i32, %arg2: i32) -> (i32, i32, i32) {
    %c0_i32 = arith.constant 0 : i32
    %c0_i32_0 = arith.constant 0 : i32
    %c0_i32_1 = arith.constant 0 : i32
    return %c0_i32, %c0_i32_0, %arg2 : i32, i32, i32
  }
  func.func @transform_3(%arg0: i32, %arg1: i32, %arg2: i32) -> (i32, i32, i32) {
    %c0_i32 = arith.constant 0 : i32
    return %arg0, %arg1, %arg2 : i32, i32, i32
  }
}

</mosaic_0001>

<bundles_post_ra>
// kernel: tpu_custom_call.1
= control target key start
LH: loop header
LB: loop body
LE: loop exit
PB: predicated region body
PF: predicated region fallthrough
CT: control target
= control target key end

     0   :  { %8 = vsyncpa [#allocation3], 0  ;;  %s2055_s0 = inlined_call_operand.vmem [shape: bf16[2,256,27], index: 0, kind: input, shape index: {}]   ;;  %s2056_s1 = inlined_call_operand.vmem [shape: bf16[27,128], index: 1, kind: input, shape index: {}]   ;;  %s2057_s2 = inlined_call_operand.vmem [shape: f32[1,1,128], index: 2, kind: input, shape index: {}]   ;;  %s2058_s3 = inlined_call_operand.hbm [shape: bf16[2,256,128], index: 3, kind: output, shape index: {}]  }
   0x1   :  { %10 = vsyncpa [#allocation3 + $0x1], 0  ;;  %s1710_s12 = smov 0   ;;  %s1712_s13 = smov 0  }
   0x2   :  { %s1714_s14 = smov 0   ;;  %s1716_s15 = smov 0  }
   0x3   :  { %s1718_s16 = smov 0   ;;  %s1720_s17 = smov 0  }
   0x4 LB: > { %s1103_s18 = sadd.s32 4294967295, %s1684_s17   ;;  %s1104_s19 = sadd.s32 4294967294, %s1684_s17   ;;  %s1684_s17 = sphi %s1720_s17, %s16_s17   ;;  %s1680_s16 = sphi %s1718_s16, %s2065_s16   ;;  %s1676_s15 = sphi %s1716_s15, %s2064_s15   ;;  %s1672_s14 = sphi %s1714_s14, %s2063_s14   ;;  %s1668_s13 = sphi %s1712_s13, %s2062_s13   ;;  %s1664_s12 = sphi %s1710_s12, %s2061_s12  }
   0x5   : > { %s35_s20 = sadd.s32 1, %s1680_s16  ;;  %s126_s21 = sadd.s32 1, %s1672_s14 }
   0x6   : > { %p37_p0 = scmp.ge.s32.totalorder %s35_s20, 2  ;;  %p136_p1 = scmp.ne.s32.totalorder %s1672_s14, %s1668_s13 }
   0x7   : > { %p137_p2 = scmp.eq.s32.totalorder %s1103_s18, 1  ;;  %p142_p3 = scmp.ne.s32.totalorder %s1668_s13, %s1664_s12 }
   0x8   : > { %s2067_s20 = smov (%p37_p0, %s35_s20), 0  ;;  %p143_p5 = scmp.eq.s32.totalorder %s1104_s19, 1 }
   0x9   : > { %p1750_p4 = por %p137_p2, %p136_p1  ;;  %s119_s23 = ssub.s32 %s1680_s16, %s2067_s20 }
   0xa   : > { %p1109_p6 = scmp.ge.s32.totalorder %s1684_s17, 1  ;;  %p124_p7 = scmp.eq.s32.totalorder %s119_s23, 0 }
   0xb   : > { %p1757_p8 = por %p143_p5, %p142_p3  ;;  %p187_p9 = scmp.lt.s32.totalorder %s1684_s17, 3 }
   0xc   : > { %s1763_s25 = scalar_select %p124_p7, %s1672_s14, %s126_s21  }
   0xd   : > { %p188_p10 = pnand %p1109_p6, %p187_p9 }
   0xe   : > { %p223_p11 = scmp.lt.s32.totalorder (!%p188_p10), %s1676_s15, 1  ;;  %s219_s10 = sand.u32 (!%p188_p10), 1, %s1668_s13  }
   0xf   : > { %191 = sbr.rel (%p188_p10) target bundleno = 325 (0x145), region = 32  ;;  %s1914_s11 = sshll.u32 (!%p188_p10), %s219_s10, 7 }
  0x10   : > { %s1945_s18 = scalar_lea.vmem (!%p188_p10), [#allocation2], %s1914_s11  ;;  %s1250_s19 = sshll.u32 (!%p188_p10), %s1676_s15, 11 }
  0x11   : > { %s993_s21 = sshll.u32 (!%p188_p10), %s1945_s18, 4  ;;  %s2010_s27 = scalar_lea.sflag (!%p188_p10), [#allocation3], %s219_s10  ;;  %s2003_s21 = int_to_ptr.vmem [resolvable:$true] %s993_s21 }
  0x12   : > { %s1608_s28 = scalar_lea.vmem (!%p188_p10), %s2003_s21, 2048  ;;  %s1687_s29 = smov (!%p188_p10), [#allocation2]  }
  0x13   : > { %p1609_p12 = scmp.ne.s32.totalorder (!%p188_p10), %s2003_s21, %s1608_s28 }
  0x14   : > { %v1462_v0 = vld [vmem:[%s2056_s1 + $0x8] sm:$0x3f]   ;;  %vm424_vm0 = vcmask 1044480   ;;  %vm425_vm1 = vcmask 1045504   ;;  %v1686_v1 = vmov 65535   ;;  %v1463_v5 = vld [vmem:[%s2056_s1] sm:$0xff]  }
  0x15   : > { %v426_v2 = vsel %vm424_vm0, 4294967295, %v1686_v1  ;;  %s224_s30 = scalar_select %p223_p11, %s1676_s15, 1  ;;  %vm375_vm2 = vcmask 220160   ;;  %v1813_v22 = vld [vmem:[%s2057_s2] ss:$0 sm:$0xff] }
  0x16   : > { %v427_v3 = vsel %vm425_vm1, %v426_v2, 0  ;;  %s2001_s15 = scalar_lea.hbm %s2058_s3, %s1250_s19  ;;  %p1610_p13 = pnand %p1609_p12, %p1750_p4 }
  0x17   : > { %v429_v4 = vand.u32 %v1462_v0, %v427_v3  ;;  %s1217_s4 = sshll.u32 %s224_s30, 7  ;;  %s1612_s30 = sshll.u32 %s1687_s29, 4  ;;  %s1613_s30 = int_to_ptr.vmem [resolvable:$false] %s1612_s30 }
  0x18   : > { %s1776_s7 = scalar_lea.vmem %s2055_s0, %s1217_s4  ;;  %p1611_p0 = pneg %p1610_p13 }
  0x19   : > { %1364 = vmatprep.subr.bf16.mxu0 %v429_v4  ;;  %1400 = vmatprep.subr.bf16.mxu1 %v429_v4  ;;  %v1464_v6 = vld [vmem:[%s1776_s7] sm:$0xff]   ;;  %v1466_v8 = vld [vmem:[%s1776_s7 + $0x8] sm:$0xff]   ;;  %v1468_v10 = vld [vmem:[%s1776_s7 + $0x10] sm:$0xff]   ;;  %s1614_s4 = scalar_lea.vmem %s1613_s30, 4096  ;;  %p1615_p1 = scmp.lt.s32.totalorder %s2003_s21, %s1613_s30 }
  0x1a   : > { %1365 = vmatpush3.bf16.msra.mxu0 %v429_v4  ;;  %1402 = vmatpush3.bf16.msra.mxu1 %v429_v4  ;;  %v1465_v7 = vld [vmem:[%s1776_s7 + $0x40] sm:$0xff]   ;;  %v1467_v9 = vld [vmem:[%s1776_s7 + $0x48] sm:$0xff]   ;;  %v1469_v11 = vld [vmem:[%s1776_s7 + $0x50] sm:$0xff]   ;;  %p1616_p2 = scmp.lt.s32.totalorder %s1614_s4, %s1608_s28 }
  0x1b   : > { %1366 = vmatprep.subr.bf16.mxu0 %v1463_v5  ;;  %1401 = vmatprep.subr.bf16.mxu1 %v1463_v5  ;;  %v1470_v12 = vld [vmem:[%s1776_s7 + $0x18] sm:$0xff]   ;;  %v1472_v14 = vld [vmem:[%s1776_s7 + $0x20] sm:$0xff]   ;;  %v1474_v16 = vld [vmem:[%s1776_s7 + $0x28] sm:$0xff]  }
  0x1c   : > { %1368 = vmatprep.mubr.msk.bf16.mxu0 %vm375_vm2, %v1464_v6  ;;  %1384 = vmatprep.mubr.msk.bf16.mxu1 %vm375_vm2, %v1465_v7  ;;  %v1471_v13 = vld [vmem:[%s1776_s7 + $0x58] sm:$0xff]   ;;  %v1473_v15 = vld [vmem:[%s1776_s7 + $0x60] sm:$0xff]   ;;  %v1475_v17 = vld [vmem:[%s1776_s7 + $0x68] sm:$0xff]   ;;  %p1617_p3 = por %p1616_p2, %p1615_p1 }
  0x1d   : > { %v1476_v18 = vld [vmem:[%s1776_s7 + $0x30] sm:$0xff]   ;;  %v1478_v20 = vld [vmem:[%s1776_s7 + $0x38] sm:$0xff]  }
  0x1e   : > { %1367 = vmatpush3.bf16.msra.mxu0 %v1463_v5  ;;  %1403 = vmatpush3.bf16.msra.mxu1 %v1463_v5  ;;  %v1477_v19 = vld [vmem:[%s1776_s7 + $0x70] sm:$0xff]   ;;  %v1479_v21 = vld [vmem:[%s1776_s7 + $0x78] sm:$0xff]   ;;  %p1618_p5 = pnand %p1617_p3, %p1611_p0 }
  0x21   : > { %1369 = vmatmul.mubr.msk.bf16.vlgmr.msra.gmra.mxu0 %vm375_vm2, %v1466_v8  ;;  %1385 = vmatmul.mubr.msk.bf16.vlgmr.msra.gmra.mxu1 %vm375_vm2, %v1467_v9 }
  0x22   : > { %1372 = vmatprep.mubr.msk.bf16.mxu0 %vm375_vm2, %v1468_v10  ;;  %1388 = vmatprep.mubr.msk.bf16.mxu1 %vm375_vm2, %v1469_v11 }
  0x29   : > { %1373 = vmatmul.mubr.msk.bf16.gmra.mxu0 %vm375_vm2, %v1470_v12  ;;  %1389 = vmatmul.mubr.msk.bf16.gmra.mxu1 %vm375_vm2, %v1471_v13 }
  0x2a   : > { %1376 = vmatprep.mubr.msk.bf16.mxu0 %vm375_vm2, %v1472_v14  ;;  %1392 = vmatprep.mubr.msk.bf16.mxu1 %vm375_vm2, %v1473_v15 }
  0x31   : > { %1377 = vmatmul.mubr.msk.bf16.gmra.mxu0 %vm375_vm2, %v1474_v16  ;;  %1393 = vmatmul.mubr.msk.bf16.gmra.mxu1 %vm375_vm2, %v1475_v17 }
  0x32   : > { %1380 = vmatprep.mubr.msk.bf16.mxu0 %vm375_vm2, %v1476_v18  ;;  %1396 = vmatprep.mubr.msk.bf16.mxu1 %vm375_vm2, %v1477_v19 }
  0x39   : > { %1381 = vmatmul.mubr.msk.bf16.gmra.mxu0 %vm375_vm2, %v1478_v20  ;;  %1397 = vmatmul.mubr.msk.bf16.gmra.mxu1 %vm375_vm2, %v1479_v21 }
  0xe1   : > { %v1370_v23 = vpop.f32.mrf.mxu0  ;;  %v1386_v24 = vpop.f32.mrf.mxu1 }
  0xe2   : > { %v1816_v25 = vadd.f32 %v1370_v23, %v1813_v22  ;;  %v1819_v26 = vadd.f32 %v1386_v24, %v1813_v22 }
  0xe3   : > { %v465_v27 = vpop.f32.mrf.mxu0  ;;  %v529_v28 = vpop.f32.mrf.mxu1 }
  0xe4   : > { %v1150_v29 = vmul.f32 -1.442695, %v1816_v25  ;;  %v1166_v30 = vmul.f32 -1.442695, %v1819_v26  ;;  %v1824_v31 = vadd.f32 %v1813_v22, %v465_v27  ;;  %v1827_v32 = vadd.f32 %v1813_v22, %v529_v28 }
  0xe5   : > { %v1371_v33 = vpop.f32.mrf.mxu0  ;;  %v1387_v34 = vpop.f32.mrf.mxu1 }
  0xe6   : > { %1480 = vpow2.f32 %v1150_v29  ;;  %v1148_v35 = vmul.f32 -1.442695, %v1824_v31  ;;  %v1164_v36 = vmul.f32 -1.442695, %v1827_v32  ;;  %v1832_v37 = vadd.f32 %v1371_v33, %v1813_v22 }
  0xe7   : > { %1482 = vpow2.f32 %v1166_v30  ;;  %v1835_v38 = vadd.f32 %v1387_v34, %v1813_v22  ;;  %v468_v39 = vpop.f32.mrf.mxu0  ;;  %v532_v40 = vpop.f32.mrf.mxu1 }
  0xe8   : > { %1484 = vpow2.f32 %v1148_v35  ;;  %v1151_v41 = vmul.f32 -1.442695, %v1832_v37  ;;  %v1839_v42 = vadd.f32 %v1813_v22, %v468_v39  ;;  %v1842_v43 = vadd.f32 %v1813_v22, %v532_v40 }
  0xe9   : > { %1486 = vpow2.f32 %v1164_v36  ;;  %v1167_v44 = vmul.f32 -1.442695, %v1835_v38  ;;  %v1374_v45 = vpop.f32.mrf.mxu0  ;;  %v1390_v46 = vpop.f32.mrf.mxu1 }
  0xea   : > { %1488 = vpow2.f32 %v1151_v41  ;;  %v1149_v47 = vmul.f32 -1.442695, %v1839_v42  ;;  %v1165_v48 = vmul.f32 -1.442695, %v1842_v43  ;;  %v1848_v49 = vadd.f32 %v1374_v45, %v1813_v22 }
  0xeb   : > { %1490 = vpow2.f32 %v1167_v44  ;;  %v1851_v50 = vadd.f32 %v1390_v46, %v1813_v22  ;;  %v481_v51 = vpop.f32.mrf.mxu0  ;;  %v545_v52 = vpop.f32.mrf.mxu1 }
  0xec   : > { %1492 = vpow2.f32 %v1149_v47  ;;  %v1154_v53 = vmul.f32 -1.442695, %v1848_v49  ;;  %v1855_v54 = vadd.f32 %v1813_v22, %v481_v51  ;;  %v1858_v55 = vadd.f32 %v1813_v22, %v545_v52 }
  0xed   : > { %1494 = vpow2.f32 %v1165_v48  ;;  %v1170_v56 = vmul.f32 -1.442695, %v1851_v50  ;;  %v1375_v57 = vpop.f32.mrf.mxu0  ;;  %v1391_v58 = vpop.f32.mrf.mxu1 }
  0xee   : > { %1496 = vpow2.f32 %v1154_v53  ;;  %v1152_v59 = vmul.f32 -1.442695, %v1855_v54  ;;  %v1168_v60 = vmul.f32 -1.442695, %v1858_v55  ;;  %v1864_v61 = vadd.f32 %v1375_v57, %v1813_v22 }
  0xef   : > { %1498 = vpow2.f32 %v1170_v56  ;;  %v1867_v62 = vadd.f32 %v1391_v58, %v1813_v22  ;;  %v484_v63 = vpop.f32.mrf.mxu0  ;;  %v548_v0 = vpop.f32.mrf.mxu1 }
  0xf0   : > { %1500 = vpow2.f32 %v1152_v59  ;;  %v1155_v1 = vmul.f32 -1.442695, %v1864_v61  ;;  %v1871_v2 = vadd.f32 %v1813_v22, %v484_v63  ;;  %v1874_v3 = vadd.f32 %v1813_v22, %v548_v0 }
  0xf1   : > { %1502 = vpow2.f32 %v1168_v60  ;;  %v1171_v4 = vmul.f32 -1.442695, %v1867_v62  ;;  %v1378_v5 = vpop.f32.mrf.mxu0  ;;  %v1394_v6 = vpop.f32.mrf.mxu1 }
  0xf2   : > { %1504 = vpow2.f32 %v1155_v1  ;;  %v1153_v7 = vmul.f32 -1.442695, %v1871_v2  ;;  %v1169_v8 = vmul.f32 -1.442695, %v1874_v3  ;;  %v1880_v39 = vadd.f32 %v1378_v5, %v1813_v22 }
  0xf3   : > { %v1481_v9 = vpop.eup %1480  ;;  %1506 = vpow2.f32 %v1171_v4  ;;  %v497_v10 = vpop.f32.mrf.mxu0  ;;  %v1883_v51 = vadd.f32 %v1394_v6, %v1813_v22 }
  0xf4   : > { %v561_v11 = vpop.f32.mrf.mxu1  ;;  %v1483_v12 = vpop.eup %1482  ;;  %v690_v13 = vadd.f32 1.0, %v1481_v9  ;;  %1508 = vpow2.f32 %v1153_v7  ;;  %v1158_v57 = vmul.f32 -1.442695, %v1880_v39  ;;  %v1887_v58 = vadd.f32 %v1813_v22, %v497_v10 }
  0xf5   : > { %v1485_v14 = vpop.eup %1484  ;;  %v706_v15 = vadd.f32 1.0, %v1483_v12  ;;  %1510 = vpow2.f32 %v1169_v8  ;;  %v1379_v16 = vpop.f32.mrf.mxu0  ;;  %v1890_v63 = vadd.f32 %v1813_v22, %v561_v11 }
  0xf6   : > { %v1487_v17 = vpop.eup %1486  ;;  %1512 = vrcp.f32 %v690_v13  ;;  %v688_v18 = vadd.f32 1.0, %v1485_v14  ;;  %v1395_v19 = vpop.f32.mrf.mxu1  ;;  %v1893_v0 = vadd.f32 %v1379_v16, %v1813_v22 }
  0xf7   : > { %v1489_v20 = vpop.eup %1488  ;;  %1514 = vrcp.f32 %v706_v15  ;;  %v704_v21 = vadd.f32 1.0, %v1487_v17  ;;  %v500_v29 = vpop.f32.mrf.mxu0  ;;  %v1897_v5 = vadd.f32 %v1395_v19, %v1813_v22  ;;  %v1174_v15 = vmul.f32 -1.442695, %v1883_v51 }
  0xf8   : > { %v1491_v23 = vpop.eup %1490  ;;  %1516 = vrcp.f32 %v688_v18  ;;  %v691_v24 = vadd.f32 1.0, %v1489_v20  ;;  %v564_v34 = vpop.f32.mrf.mxu1  ;;  %v1900_v6 = vadd.f32 %v1813_v22, %v500_v29  ;;  %v1156_v18 = vmul.f32 -1.442695, %v1887_v58 }
  0xf9   : > { %v1493_v27 = vpop.eup %1492  ;;  %1518 = vrcp.f32 %v704_v21  ;;  %v707_v28 = vadd.f32 1.0, %v1491_v23  ;;  %v1382_v46 = vpop.f32.mrf.mxu0  ;;  %v1903_v10 = vadd.f32 %v1813_v22, %v564_v34  ;;  %v1172_v20 = vmul.f32 -1.442695, %v1890_v63 }
  0xfa   : > { %v1495_v30 = vpop.eup %1494  ;;  %1520 = vrcp.f32 %v691_v24  ;;  %v689_v33 = vadd.f32 1.0, %v1493_v27  ;;  %v1398_v52 = vpop.f32.mrf.mxu1  ;;  %v1906_v11 = vadd.f32 %v1382_v46, %v1813_v22  ;;  %v1159_v21 = vmul.f32 -1.442695, %v1893_v0 }
  0xfb   : > { %v1497_v35 = vpop.eup %1496  ;;  %1522 = vrcp.f32 %v707_v28  ;;  %v705_v36 = vadd.f32 1.0, %v1495_v30  ;;  %v513_v7 = vpop.f32.mrf.mxu0  ;;  %v1910_v16 = vadd.f32 %v1398_v52, %v1813_v22  ;;  %v1175_v23 = vmul.f32 -1.442695, %v1897_v5 }
  0xfc   : > { %v1499_v40 = vpop.eup %1498  ;;  %1524 = vrcp.f32 %v689_v33  ;;  %v694_v41 = vadd.f32 1.0, %v1497_v35  ;;  %v577_v12 = vpop.f32.mrf.mxu1  ;;  %v1157_v28 = vmul.f32 -1.442695, %v1900_v6  ;;  %v1173_v29 = vmul.f32 -1.442695, %v1903_v10 }
  0xfd   : > { %v1501_v44 = vpop.eup %1500  ;;  %1526 = vrcp.f32 %v705_v36  ;;  %v710_v45 = vadd.f32 1.0, %v1499_v40  ;;  %v1383_v24 = vpop.f32.mrf.mxu0  ;;  %v1162_v30 = vmul.f32 -1.442695, %v1906_v11  ;;  %v1178_v35 = vmul.f32 -1.442695, %v1910_v16 }
  0xfe   : > { %v1503_v47 = vpop.eup %1502  ;;  %1528 = vrcp.f32 %v694_v41  ;;  %v692_v48 = vadd.f32 1.0, %v1501_v44  ;;  %v1399_v33 = vpop.f32.mrf.mxu1  ;;  %v1925_v36 = vadd.f32 %v1813_v22, %v513_v7  ;;  %v1928_v40 = vadd.f32 %v1813_v22, %v577_v12 }
  0xff   : > { %v1505_v53 = vpop.eup %1504  ;;  %1530 = vrcp.f32 %v710_v45  ;;  %v708_v56 = vadd.f32 1.0, %v1503_v47  ;;  %v1933_v46 = vadd.f32 %v1383_v24, %v1813_v22 }
 0x100   : > { %v1507_v59 = vpop.eup %1506  ;;  %1532 = vrcp.f32 %v692_v48  ;;  %v695_v60 = vadd.f32 1.0, %v1505_v53  ;;  %v1938_v53 = vadd.f32 %v1399_v33, %v1813_v22 }
 0x101   : > { %v1509_v1 = vpop.eup %1508  ;;  %1534 = vrcp.f32 %v708_v56  ;;  %v711_v4 = vadd.f32 1.0, %v1507_v59  ;;  %v516_v56 = vpop.f32.mrf.mxu0 }
 0x102   : > { %v1511_v8 = vpop.eup %1510  ;;  %1536 = vrcp.f32 %v695_v60  ;;  %v693_v9 = vadd.f32 1.0, %v1509_v1  ;;  %v580_v60 = vpop.f32.mrf.mxu1 }
 0x103   : > { %v1513_v13 = vpop.eup %1512  ;;  %1538 = vrcp.f32 %v711_v4  ;;  %v709_v14 = vadd.f32 1.0, %v1511_v8  ;;  %v1950_v8 = vadd.f32 %v1813_v22, %v516_v56  ;;  %v1955_v12 = vadd.f32 %v1813_v22, %v580_v60 }
 0x104   : > { %v1515_v17 = vpop.eup %1514  ;;  %1540 = vrcp.f32 %v693_v9  ;;  %v786_v44 = vmul.f32 %v1513_v13, %v1816_v25 }
 0x105   : > { %v1517_v19 = vpop.eup %1516  ;;  %1542 = vrcp.f32 %v709_v14  ;;  %v802_v48 = vmul.f32 %v1515_v17, %v1819_v26  ;;  %v1163_v14 = vmul.f32 -1.442695, %v1933_v46  ;;  %v1179_v17 = vmul.f32 -1.442695, %v1938_v53 }
 0x106   : > { %v1519_v27 = vpop.eup %1518  ;;  %1544 = vpow2.f32 %v1158_v57  ;;  %v784_v25 = vmul.f32 %v1517_v19, %v1824_v31 }
 0x107   : > { %v1521_v34 = vpop.eup %1520  ;;  %1546 = vpow2.f32 %v1174_v15  ;;  %v800_v4 = vmul.f32 %v1519_v27, %v1827_v32  ;;  %v1177_v27 = vmul.f32 -1.442695, %v1955_v12 }
 0x108   : > { %v1523_v41 = vpop.eup %1522  ;;  %v787_v45 = vmul.f32 %v1521_v34, %v1832_v37  ;;  %1548 = vpow2.f32 %v1156_v18 }
 0x109   : > { %v1525_v47 = vpop.eup %1524  ;;  %v803_v52 = vmul.f32 %v1523_v41, %v1835_v38  ;;  %1550 = vpow2.f32 %v1172_v20 }
 0x10a   : > { %v1527_v57 = vpop.eup %1526  ;;  %v1259_v59 = vpack.c.bf16 %v787_v45, %v786_v44  ;;  %v785_v37 = vmul.f32 %v1525_v47, %v1839_v42  ;;  %1552 = vpow2.f32 %v1159_v21  ;;  %v1160_v42 = vmul.f32 -1.442695, %v1925_v36 }
 0x10b   : > { %v1529_v1 = vpop.eup %1528  ;;  %v1299_v26 = vpack.c.bf16 %v803_v52, %v802_v48  ;;  %v801_v38 = vmul.f32 %v1527_v57, %v1842_v43  ;;  %1554 = vpow2.f32 %v1175_v23  ;;  %v1176_v43 = vmul.f32 -1.442695, %v1928_v40 }
 0x10c   : > { %v1531_v7 = vpop.eup %1530  ;;  %1331 = vst [vmem:[%s1945_s18 + $0x8] sm:$0xff] %v1259_v59   ;;  %v1254_v31 = vpack.c.bf16 %v785_v37, %v784_v25  ;;  %1556 = vpow2.f32 %v1157_v28  ;;  %v790_v19 = vmul.f32 %v1529_v1, %v1848_v49  ;;  %v1161_v21 = vmul.f32 -1.442695, %v1950_v8 }
 0x10d   : > { %v1533_v32 = vpop.eup %1532  ;;  %1339 = vst [vmem:[%s1945_s18 + $0x48] sm:$0xff] %v1299_v26   ;;  %v1294_v9 = vpack.c.bf16 %v801_v38, %v800_v4  ;;  %1558 = vpow2.f32 %v1173_v29  ;;  %v806_v23 = vmul.f32 %v1531_v7, %v1851_v50 }
 0x10e   : > { %v1535_v13 = vpop.eup %1534  ;;  %1255 = vst [vmem:[%s1945_s18] sm:$0xff] %v1254_v31   ;;  %1560 = vpow2.f32 %v1162_v30  ;;  %v788_v29 = vmul.f32 %v1533_v32, %v1855_v54 }
 0x10f   : > { %v1537_v15 = vpop.eup %1536  ;;  %1338 = vst [vmem:[%s1945_s18 + $0x40] sm:$0xff] %v1294_v9   ;;  %1562 = vpow2.f32 %v1178_v35  ;;  %v804_v33 = vmul.f32 %v1535_v13, %v1858_v55 }
 0x110   : > { %v1539_v18 = vpop.eup %1538  ;;  %v791_v20 = vmul.f32 %v1537_v15, %v1864_v61  ;;  %1564 = vpow2.f32 %v1160_v42 }
 0x111   : > { %v1541_v22 = vpop.eup %1540  ;;  %v807_v24 = vmul.f32 %v1539_v18, %v1867_v62  ;;  %1566 = vpow2.f32 %v1176_v43 }
 0x112   : > { %v1543_v28 = vpop.eup %1542  ;;  %v1269_v30 = vpack.c.bf16 %v791_v20, %v790_v19  ;;  %v789_v49 = vmul.f32 %v1541_v22, %v1871_v2  ;;  %1568 = vpow2.f32 %v1163_v14 }
 0x113   : > { %v1545_v61 = vpop.eup %1544  ;;  %v1309_v34 = vpack.c.bf16 %v807_v24, %v806_v23  ;;  %v805_v50 = vmul.f32 %v1543_v28, %v1874_v3  ;;  %1570 = vpow2.f32 %v1179_v17 }
 0x114   : > { %v1547_v62 = vpop.eup %1546  ;;  %1333 = vst [vmem:[%s1945_s18 + $0x18] sm:$0xff] %v1269_v30   ;;  %v1264_v35 = vpack.c.bf16 %v789_v49, %v788_v29  ;;  %v698_v41 = vadd.f32 1.0, %v1545_v61  ;;  %1572 = vpow2.f32 %v1161_v21 }
 0x115   : > { %v1549_v44 = vpop.eup %1548  ;;  %1341 = vst [vmem:[%s1945_s18 + $0x58] sm:$0xff] %v1309_v34   ;;  %v1304_v54 = vpack.c.bf16 %v805_v50, %v804_v33  ;;  %v714_v45 = vadd.f32 1.0, %v1547_v62  ;;  %1574 = vpow2.f32 %v1177_v27 }
 0x116   : > { %v1551_v2 = vpop.eup %1550  ;;  %1332 = vst [vmem:[%s1945_s18 + $0x10] sm:$0xff] %v1264_v35   ;;  %1576 = vrcp.f32 %v698_v41  ;;  %v696_v47 = vadd.f32 1.0, %v1549_v44 }
 0x117   : > { %v1553_v55 = vpop.eup %1552  ;;  %1340 = vst [vmem:[%s1945_s18 + $0x50] sm:$0xff] %v1304_v54   ;;  %1578 = vrcp.f32 %v714_v45  ;;  %v712_v3 = vadd.f32 1.0, %v1551_v2 }
 0x118   : > { %v1555_v48 = vpop.eup %1554  ;;  %1580 = vrcp.f32 %v696_v47  ;;  %v699_v52 = vadd.f32 1.0, %v1553_v55 }
 0x119   : > { %v1557_v56 = vpop.eup %1556  ;;  %1582 = vrcp.f32 %v712_v3  ;;  %v715_v57 = vadd.f32 1.0, %v1555_v48 }
 0x11a   : > { %v1559_v25 = vpop.eup %1558  ;;  %1584 = vrcp.f32 %v699_v52  ;;  %v697_v59 = vadd.f32 1.0, %v1557_v56 }
 0x11b   : > { %v1561_v37 = vpop.eup %1560  ;;  %1586 = vrcp.f32 %v715_v57  ;;  %v713_v60 = vadd.f32 1.0, %v1559_v25 }
 0x11c   : > { %v1563_v1 = vpop.eup %1562  ;;  %1588 = vrcp.f32 %v697_v59  ;;  %v702_v4 = vadd.f32 1.0, %v1561_v37 }
 0x11d   : > { %v1565_v26 = vpop.eup %1564  ;;  %1590 = vrcp.f32 %v713_v60  ;;  %v718_v38 = vadd.f32 1.0, %v1563_v1 }
 0x11e   : > { %v1567_v7 = vpop.eup %1566  ;;  %1592 = vrcp.f32 %v702_v4  ;;  %v700_v31 = vadd.f32 1.0, %v1565_v26 }
 0x11f   : > { %v1569_v42 = vpop.eup %1568  ;;  %1594 = vrcp.f32 %v718_v38  ;;  %v716_v32 = vadd.f32 1.0, %v1567_v7 }
 0x120   : > { %v1571_v9 = vpop.eup %1570  ;;  %1596 = vrcp.f32 %v700_v31  ;;  %v703_v43 = vadd.f32 1.0, %v1569_v42 }
 0x121   : > { %v1573_v13 = vpop.eup %1572  ;;  %1598 = vrcp.f32 %v716_v32  ;;  %v719_v14 = vadd.f32 1.0, %v1571_v9 }
 0x122   : > { %v1575_v15 = vpop.eup %1574  ;;  %1600 = vrcp.f32 %v703_v43  ;;  %v701_v17 = vadd.f32 1.0, %v1573_v13 }
 0x123   : > { %v1577_v18 = vpop.eup %1576  ;;  %1602 = vrcp.f32 %v719_v14  ;;  %v717_v19 = vadd.f32 1.0, %v1575_v15 }
 0x124   : > { %v1579_v20 = vpop.eup %1578  ;;  %1604 = vrcp.f32 %v701_v17  ;;  %v794_v27 = vmul.f32 %v1577_v18, %v1880_v39 }
 0x125   : > { %v1581_v21 = vpop.eup %1580  ;;  %1606 = vrcp.f32 %v717_v19  ;;  %v810_v30 = vmul.f32 %v1579_v20, %v1883_v51 }
 0x126   : > { %v1583_v22 = vpop.eup %1582  ;;  %v792_v33 = vmul.f32 %v1581_v21, %v1887_v58 }
 0x127   : > { %v1585_v23 = vpop.eup %1584  ;;  %v808_v35 = vmul.f32 %v1583_v22, %v1890_v63 }
 0x128   : > { %v1587_v24 = vpop.eup %1586  ;;  %v795_v28 = vmul.f32 %v1585_v23, %v1893_v0 }
 0x129   : > { %v1589_v29 = vpop.eup %1588  ;;  %v811_v49 = vmul.f32 %v1587_v24, %v1897_v5 }
 0x12a   : > { %v1591_v61 = vpop.eup %1590  ;;  %v1279_v34 = vpack.c.bf16 %v795_v28, %v794_v27  ;;  %v793_v50 = vmul.f32 %v1589_v29, %v1900_v6 }
 0x12b   : > { %v1593_v62 = vpop.eup %1592  ;;  %v1319_v39 = vpack.c.bf16 %v811_v49, %v810_v30  ;;  %v809_v0 = vmul.f32 %v1591_v61, %v1903_v10 }
 0x12c   : > { %v1595_v41 = vpop.eup %1594  ;;  %1335 = vst [vmem:[%s1945_s18 + $0x28] sm:$0xff] %v1279_v34   ;;  %v1274_v51 = vpack.c.bf16 %v793_v50, %v792_v33  ;;  %v798_v45 = vmul.f32 %v1593_v62, %v1906_v11 }
 0x12d   : > { %v1597_v5 = vpop.eup %1596  ;;  %1343 = vst [vmem:[%s1945_s18 + $0x68] sm:$0xff] %v1319_v39   ;;  %v1314_v44 = vpack.c.bf16 %v809_v0, %v808_v35  ;;  %v814_v10 = vmul.f32 %v1595_v41, %v1910_v16 }
 0x12e   : > { %v1599_v54 = vpop.eup %1598  ;;  %1334 = vst [vmem:[%s1945_s18 + $0x20] sm:$0xff] %v1274_v51   ;;  %v796_v3 = vmul.f32 %v1597_v5, %v1925_v36 }
 0x12f   : > { %v1601_v58 = vpop.eup %1600  ;;  %1342 = vst [vmem:[%s1945_s18 + $0x60] sm:$0xff] %v1314_v44  }
 0x130   : > { %v1603_v6 = vpop.eup %1602  ;;  %v799_v63 = vmul.f32 %v1601_v58, %v1933_v46  ;;  %v812_v46 = vmul.f32 %v1599_v54, %v1928_v40 }
 0x131   : > { %v1605_v2 = vpop.eup %1604  ;;  %v815_v47 = vmul.f32 %v1603_v6, %v1938_v53 }
 0x132   : > { %v1607_v55 = vpop.eup %1606  ;;  %v1289_v48 = vpack.c.bf16 %v799_v63, %v798_v45  ;;  %v797_v11 = vmul.f32 %v1605_v2, %v1950_v8 }
 0x133   : > { %v1329_v52 = vpack.c.bf16 %v815_v47, %v814_v10  ;;  %v813_v56 = vmul.f32 %v1607_v55, %v1955_v12 }
 0x134   : > { %1337 = vst [vmem:[%s1945_s18 + $0x38] sm:$0xff] %v1289_v48   ;;  %v1284_v16 = vpack.c.bf16 %v797_v11, %v796_v3 }
 0x135   : > { %1345 = vst [vmem:[%s1945_s18 + $0x78] sm:$0xff] %v1329_v52   ;;  %v1324_v36 = vpack.c.bf16 %v813_v56, %v812_v46 }
 0x136   : > { %1336 = vst [vmem:[%s1945_s18 + $0x30] sm:$0xff] %v1284_v16  }
 0x137   : > { %1344 = vst [vmem:[%s1945_s18 + $0x70] sm:$0xff] %v1324_v36  }
 0x138   : > { %1621 = shalt.err (!%p1618_p5)
}
 0x139   : > { %s1622_s5 = scalar_lea.hbm %s2001_s15, 2048  ;;  %s1626_s8 = scalar_lea.hbm %s2058_s3, 4096 }
 0x13a   : > { %p1623_p6 = scmp.ne.s32.totalorder %s2001_s15, %s1622_s5  ;;  %p1627_p10 = scmp.lt.s32.totalorder %s2001_s15, %s2058_s3 }
 0x13b   : > { %p1628_p11 = scmp.lt.s32.totalorder %s1626_s8, %s1622_s5 }
 0x13c   : > { %p1624_p7 = pnand %p1623_p6, %p1750_p4 }
 0x13d   : > { %p1629_p12 = por %p1628_p11, %p1627_p10 }
 0x13e   : > { %p1625_p9 = pneg %p1624_p7 }
 0x140   : > { %p1630_p13 = pnand %p1629_p12, %p1625_p9 }
 0x142   : > { %1633 = shalt.err (!%p1630_p13)
}
 0x143   : > { %s1688_s11 = smov 64   ;;  %s1689_s18 = smov 4  }
 0x144   : > { %1404 = dma.vmem_to_hbm [thread:$0]  (%p1750_p4), %s2003_s21, 2048, %s2001_s15, %s2010_s27, %s1688_s11, %s1688_s11, %s1689_s18  }
 0x145 PF: > { %p1410_p0 = scmp.ge.s32.totalorder %s1684_s17, 2  ;;  %s1008_s19 = sand.u32 1, %s1664_s12  }
 0x146   : > { %s1009_s23 = scalar_lea.sflag [#allocation3], %s1008_s19 }
 0x147   : > { %p1407_p1 = pnand %p1410_p0, %p1757_p8 }
 0x149   : > { %p1408_p2 = pneg %p1407_p1 }
 0x14b   : > { %1659 = dma.done.wait (%p1408_p2), %s1009_s23, 2048  }
 0x14c   : > { %1661 = vsyncadd (%p1408_p2), %s1009_s23, 4294965248  ;;  %s16_s17 = sadd.s32 1, %s1684_s17   ;;  %s2061_s12 = smov %s1668_s13 }
 0x14d   : > { %p13_p3 = scmp.ge.s32.totalorder %s16_s17, 4   ;;  %s2062_s13 = smov %s1672_s14 }
 0x14e   : > { %s2063_s14 = smov %s1763_s25  ;;  %s2064_s15 = smov %s1680_s16 }
 0x14f   : > { %s2065_s16 = smov %s2067_s20  ;;  %15 = sbr.rel (!%p13_p3) target bundleno = 4 (0x4), region = 73 }
 0x154   :  { %1014 = vsyncpa [#allocation3], 1 }
 0x155   :  { %1016 = vsyncpa [#allocation3 + $0x1], 1 }

</bundles_post_ra>
